<compile_context>
chip_gen: v6e
topology: v6e:2x2x1
jax: 0.10.0
libtpu: 0.0.40
codegen_flags: <defaults>
</compile_context>

<pallas_src>
import functools

import numpy as np
import jax
import jax.numpy as jnp
from jax import lax
from jax.experimental import pallas as pl
from jax.experimental.pallas import tpu as pltpu


@functools.lru_cache(maxsize=None)
def _build_imdct_matrix(frame_len: int) -> np.ndarray:
    """Real (N, 2N) matrix M with X[b, l] @ M == window * Re(post * ifft(Y * pre)) * sqrt(2N)."""
    N = frame_len // 2
    n0 = (N + 1) / 2.0
    # scipy.signal.cosine(frame_len) == sin(pi/M * (arange(M) + 0.5))
    window = np.sin(np.pi / frame_len * (np.arange(frame_len) + 0.5))
    pre = np.exp(1j * np.pi * n0 * np.arange(2 * N) / N)
    post = np.exp(1j * np.pi * (np.arange(2 * N) + n0) / (2 * N))
    # Extension operator E (N, 2N): Y[:N] = X, Y[N:] = -flip(X)  (conj of real X is X)
    E = np.zeros((N, 2 * N), dtype=np.float64)
    E[np.arange(N), np.arange(N)] = 1.0
    E[np.arange(N), 2 * N - 1 - np.arange(N)] = -1.0
    y = np.fft.ifft(E * pre[None, :], axis=-1)               # linear -> exact matrix form
    M = np.real(y * post[None, :]) * np.sqrt(N) * np.sqrt(2.0) * window[None, :]
    return M.astype(np.float32)


def _imdct_kernel(x_ref, m_ref, o_ref, c_ref):
    # x_ref: (1, TL, N)   compute dtype  (MDCT coefficients for TL frames)
    # m_ref: (2, N, N)    compute dtype  (M[0] -> first half of frame, M[1] -> second half)
    # o_ref: (1, TL, N)   out dtype      (overlap-added rows of this tile)
    # c_ref: (1, 1, 8, N) f32            (row 0 = carry into the next tile / final row)
    TL, N = x_ref.shape[1], x_ref.shape[2]
    x = x_ref[0]
    # Two MXU matmuls with f32 accumulation.
    first = jnp.dot(x, m_ref[0], preferred_element_type=jnp.float32)   # -> output row l
    second = jnp.dot(x, m_ref[1], preferred_element_type=jnp.float32)  # -> output row l + 1
    # hop = N overlap-add inside the tile: shift `second` down one frame with an
    # XLU roll and zero the wrapped row, so the main store stays fully aligned.
    rolled = pltpu.roll(second, shift=1, axis=0)              # rolled[r] = second[r-1]
    row_id = lax.broadcasted_iota(jnp.int32, (TL, N), 0)
    o_ref[0] = (first + jnp.where(row_id == 0, 0.0, rolled)).astype(o_ref.dtype)
    # Carry second[TL-1] (= rolled[0]) out; rows 1..7 are ignored by the wrapper
    # but keep this an aligned unmasked (8, N) store.
    c_ref[0, 0] = rolled[:8, :]


def imdct(X: jax.Array, frame_len: int, padding: str = "same", *,
          tile_l: int = 512, compute_dtype=jnp.bfloat16,
          out_dtype=jnp.float32) -> jax.Array:
    """X: (B, L, N) real MDCT coefficients -> (B, T) waveform (matches the PyTorch IMDCT).

    Notes:
      * Best lane utilization when N (= frame_len // 2) is a multiple of 128
        (true for real vocos configs); other N still work, just lane-sparse.
      * compute_dtype=bf16 quantizes both X and M (~1e-2 relative error); pass
        jnp.float32 when full fidelity matters.  out_dtype=bf16 can be used to
        cut output HBM traffic on HBM-bound chips (v6e).
    """
    if padding not in ("center", "same"):
        raise ValueError("Padding must be 'center' or 'same'.")
    B, L, N = X.shape
    assert frame_len == 2 * N, "frame_len must equal 2 * N"
    compute_dtype = jnp.dtype(compute_dtype)
    out_dtype = jnp.dtype(out_dtype)

    # Frame-axis tile with an MXU-friendly floor: tiny clips = one tile,
    # long clips = a multiple of 256 rows (never an MXU-starving 8-row tile).
    MIN_TILE = 256
    if L <= MIN_TILE:
        TL = max(8, ((L + 7) // 8) * 8)
    else:
        TL = max(MIN_TILE, (int(tile_l) // MIN_TILE) * MIN_TILE)
        TL = min(TL, ((L + MIN_TILE - 1) // MIN_TILE) * MIN_TILE)
    nt = pl.cdiv(L, TL)
    Lp = nt * TL

    # Cast BEFORE padding (single input pass); skip the pad when already aligned.
    Xc = X.astype(compute_dtype)
    if Lp != L:
        Xc = jnp.pad(Xc, ((0, 0), (0, Lp - L), (0, 0)))

    # Synthesis matrix as two aligned (N, N) halves.  Host matrix is lru_cached;
    # the device constant is created per call (folded under jit) to avoid a
    # stale-device cache footgun.
    M = _build_imdct_matrix(frame_len)
    Mh = jnp.asarray(np.stack([M[:, :N], M[:, N:]], axis=0), dtype=compute_dtype)

    in_bytes = Xc.size * Xc.dtype.itemsize + Mh.size * Mh.dtype.itemsize
    out_bytes = B * Lp * N * out_dtype.itemsize + B * nt * 8 * N * 4

    out_main, out_carry = pl.pallas_call(
        _imdct_kernel,
        out_shape=(
            jax.ShapeDtypeStruct((B, Lp, N), out_dtype),
            jax.ShapeDtypeStruct((B, nt, 8, N), jnp.float32),
        ),
        grid_spec=pltpu.PrefetchScalarGridSpec(
            num_scalar_prefetch=0,
            grid=(B, nt),
            in_specs=[
                pl.BlockSpec((1, TL, N), lambda b, t: (b, t, 0)),
                # Grid-invariant synthesis matrix: constant index_map -> DMA'd once.
                # (Its double buffer costs <= ~1 MiB for real configs, so we keep
                #  the default buffering for robustness instead of pl.Buffered(1).)
                pl.BlockSpec((2, N, N), lambda b, t: (0, 0, 0)),
            ],
            out_specs=[
                pl.BlockSpec((1, TL, N), lambda b, t: (b, t, 0)),
                pl.BlockSpec((1, 1, 8, N), lambda b, t: (b, t, 0, 0)),
            ],
        ),
        compiler_params=pltpu.CompilerParams(
            dimension_semantics=("parallel", "parallel"),
            vmem_limit_bytes=32 * 1024 * 1024,
        ),
        cost_estimate=pl.CostEstimate(
            flops=2 * B * Lp * N * (2 * N),
            transcendentals=0,
            bytes_accessed=in_bytes + out_bytes,
        ),
    )(Xc, Mh)

    # Tiny stitch: add the one-row seam carried past each tile boundary, then trim.
    carry = out_carry[:, :, 0, :].astype(out_dtype)            # (B, nt, N)
    main = out_main                                            # (B, Lp, N)
    if nt > 1:
        seam_rows = np.arange(1, nt) * TL
        main = main.at[:, seam_rows, :].add(carry[:, :-1, :])
    flat = main.reshape(B, Lp * N)                             # free reshape

    pad = frame_len // 2 if padding == "center" else frame_len // 4
    start, end = pad, (L + 1) * N - pad                        # torch: audio[:, pad:-pad]
    if end <= Lp * N:
        return flat[:, start:end]
    # Only when L is an exact multiple of TL: the last few samples live in the carry.
    tail = carry[:, -1, : end - Lp * N]
    return jnp.concatenate([flat[:, start:], tail], axis=1)


def _numpy_reference(X: np.ndarray, frame_len: int, padding: str) -> np.ndarray:
    """Pure numpy reference mirroring torch.nn.functional.fold overlap-add semantics."""
    B, L, N = X.shape
    M = _build_imdct_matrix(frame_len).astype(np.float64)
    frames = X.astype(np.float64) @ M                          # (B, L, 2N)
    audio = np.zeros((B, (L + 1) * N), dtype=np.float64)
    for l in range(L):
        audio[:, l * N:l * N + 2 * N] += frames[:, l, :]
    pad = frame_len // 2 if padding == "center" else frame_len // 4
    return audio[:, pad:-pad]


if __name__ == "__main__":
    frame_len = 256            # -> N = 128 frequency bins (lane-dense last dim)
    N = frame_len // 2

    key = jax.random.PRNGKey(0)
    k1, k2 = jax.random.split(key)

    # 1) Small clip, f32 operands: tight check of matmul + roll overlap-add + carry tail.
    B, L = 2, 8
    X = jax.random.normal(k1, (B, L, N), dtype=jnp.float32)
    ref = _numpy_reference(np.asarray(X), frame_len, "same")
    y32 = jax.block_until_ready(imdct(X, frame_len, "same", compute_dtype=jnp.float32))
    assert y32.shape == ref.shape, (y32.shape, ref.shape)
    np.testing.assert_allclose(np.asarray(y32), ref, rtol=2e-3, atol=2e-3)

    # 2) Default bf16 operands / f32 accumulation: looser numerics expected.
    ybf = jax.block_until_ready(imdct(X, frame_len, "same"))
    np.testing.assert_allclose(np.asarray(ybf), ref, rtol=5e-2, atol=5e-2)

    # 3) "center" padding branch.
    refc = _numpy_reference(np.asarray(X), frame_len, "center")
    yc = jax.block_until_ready(imdct(X, frame_len, "center", compute_dtype=jnp.float32))
    np.testing.assert_allclose(np.asarray(yc), refc, rtol=2e-3, atol=2e-3)

    # 4) Multi-tile path: exercises the seam scatter-add and zero-frame padding (Lp > L).
    B2, L2 = 2, 300
    X2 = jax.random.normal(k2, (B2, L2, N), dtype=jnp.float32)
    ref2 = _numpy_reference(np.asarray(X2), frame_len, "same")
    y2 = jax.block_until_ready(
        imdct(X2, frame_len, "same", tile_l=256, compute_dtype=jnp.float32))
    np.testing.assert_allclose(np.asarray(y2), ref2, rtol=2e-3, atol=2e-3)

    print("KERNEL_OK")
</pallas_src>

<mosaic_0001>
module attributes {stable_mosaic.version = 11 : i64} {
  func.func @_imdct_kernel(%arg0: i32, %arg1: i32, %arg2: memref<1x8x128xf32, #tpu.memory_space<vmem>>, %arg3: memref<2x128x128xf32, #tpu.memory_space<vmem>>, %arg4: memref<1x8x128xf32, #tpu.memory_space<vmem>>, %arg5: memref<1x1x8x128xf32, #tpu.memory_space<vmem>>) attributes {dimension_semantics = [#tpu.dimension_semantics<parallel>, #tpu.dimension_semantics<parallel>], iteration_bounds = array<i64: 2, 1>, scalar_prefetch = 0 : i64, scratch_operands = 0 : i64, tpu.core_type = #tpu.core_type<tc>, window_params = [{transform_indices = @transform_0, window_bounds = array<i64: 1, 8, 128>}, {pipeline_mode = #tpu.pipeline_mode<synchronous>, transform_indices = @transform_1, window_bounds = array<i64: 2, 128, 128>}, {transform_indices = @transform_2, window_bounds = array<i64: 1, 8, 128>}, {transform_indices = @transform_3, window_bounds = array<i64: 1, 1, 8, 128>}]} {
    %c0 = arith.constant 0 : index
    %c0_0 = arith.constant 0 : index
    %c0_1 = arith.constant 0 : index
    %0 = vector.load %arg2[%c0, %c0_0, %c0_1] : memref<1x8x128xf32, #tpu.memory_space<vmem>>, vector<1x8x128xf32>
    %1 = vector.shape_cast %0 : vector<1x8x128xf32> to vector<8x128xf32>
    %c0_2 = arith.constant 0 : index
    %c0_3 = arith.constant 0 : index
    %c0_4 = arith.constant 0 : index
    %2 = vector.load %arg3[%c0_2, %c0_3, %c0_4] : memref<2x128x128xf32, #tpu.memory_space<vmem>>, vector<1x128x128xf32>
    %3 = vector.shape_cast %2 : vector<1x128x128xf32> to vector<128x128xf32>
    %cst = arith.constant dense<0.000000e+00> : vector<8x128xf32>
    %4 = tpu.matmul %1, %3, %cst {dimension_numbers = #tpu.dot_dimension_numbers<[1], [0], [0], [1], [0, 0, 1, 1], [], []>} : vector<8x128xf32>, vector<128x128xf32>, vector<8x128xf32> -> vector<8x128xf32>
    %c1 = arith.constant 1 : index
    %c0_5 = arith.constant 0 : index
    %c0_6 = arith.constant 0 : index
    %5 = vector.load %arg3[%c1, %c0_5, %c0_6] : memref<2x128x128xf32, #tpu.memory_space<vmem>>, vector<1x128x128xf32>
    %6 = vector.shape_cast %5 : vector<1x128x128xf32> to vector<128x128xf32>
    %cst_7 = arith.constant dense<0.000000e+00> : vector<8x128xf32>
    %7 = tpu.matmul %1, %6, %cst_7 {dimension_numbers = #tpu.dot_dimension_numbers<[1], [0], [0], [1], [0, 0, 1, 1], [], []>} : vector<8x128xf32>, vector<128x128xf32>, vector<8x128xf32> -> vector<8x128xf32>
    %c1_i32 = arith.constant 1 : i32
    %8 = tpu.dynamic_rotate %7 by %c1_i32 dim 0 : vector<8x128xf32>, i32 -> vector<8x128xf32>
    %9 = tpu.iota {dimensions = array<i32: 0>} : vector<8x128xi32>
    %c0_i32 = arith.constant 0 : i32
    %10 = vector.broadcast %c0_i32 : i32 to vector<8x128xi32>
    %11 = arith.cmpi eq, %9, %10 : vector<8x128xi32>
    %cst_8 = arith.constant 0.000000e+00 : f32
    %12 = vector.broadcast %cst_8 : f32 to vector<8x128xf32>
    %13 = arith.select %11, %12, %8 : vector<8x128xi1>, vector<8x128xf32>
    %14 = arith.addf %4, %13 : vector<8x128xf32>
    %c0_9 = arith.constant 0 : index
    %c0_10 = arith.constant 0 : index
    %c0_11 = arith.constant 0 : index
    %15 = vector.load %arg4[%c0_9, %c0_10, %c0_11] : memref<1x8x128xf32, #tpu.memory_space<vmem>>, vector<1x8x128xf32>
    %16 = vector.shape_cast %15 : vector<1x8x128xf32> to vector<8x128xf32>
    %17 = vector.shape_cast %14 : vector<8x128xf32> to vector<1x8x128xf32>
    tpu.vector_store %arg4[%c0_9, %c0_10, %c0_11], %17 {strides = array<i32>} : memref<1x8x128xf32, #tpu.memory_space<vmem>>, vector<1x8x128xf32>,
    %c0_12 = arith.constant 0 : index
    %c0_13 = arith.constant 0 : index
    %c0_14 = arith.constant 0 : index
    %c0_15 = arith.constant 0 : index
    %18 = vector.load %arg5[%c0_12, %c0_13, %c0_14, %c0_15] : memref<1x1x8x128xf32, #tpu.memory_space<vmem>>, vector<1x1x8x128xf32>
    %19 = vector.shape_cast %18 : vector<1x1x8x128xf32> to vector<8x128xf32>
    %20 = vector.shape_cast %8 : vector<8x128xf32> to vector<1x1x8x128xf32>
    tpu.vector_store %arg5[%c0_12, %c0_13, %c0_14, %c0_15], %20 {strides = array<i32>} : memref<1x1x8x128xf32, #tpu.memory_space<vmem>>, vector<1x1x8x128xf32>,
    return
  }
  func.func @transform_0(%arg0: i32, %arg1: i32) -> (i32, i32, i32) {
    %c0_i32 = arith.constant 0 : i32
    %c0_i32_0 = arith.constant 0 : i32
    return %arg0, %arg1, %c0_i32 : i32, i32, i32
  }
  func.func @transform_1(%arg0: i32, %arg1: i32) -> (i32, i32, i32) {
    %c0_i32 = arith.constant 0 : i32
    %c0_i32_0 = arith.constant 0 : i32
    %c0_i32_1 = arith.constant 0 : i32
    %c0_i32_2 = arith.constant 0 : i32
    return %c0_i32, %c0_i32_0, %c0_i32_1 : i32, i32, i32
  }
  func.func @transform_2(%arg0: i32, %arg1: i32) -> (i32, i32, i32) {
    %c0_i32 = arith.constant 0 : i32
    %c0_i32_0 = arith.constant 0 : i32
    return %arg0, %arg1, %c0_i32 : i32, i32, i32
  }
  func.func @transform_3(%arg0: i32, %arg1: i32) -> (i32, i32, i32, i32) {
    %c0_i32 = arith.constant 0 : i32
    %c0_i32_0 = arith.constant 0 : i32
    %c0_i32_1 = arith.constant 0 : i32
    return %arg0, %arg1, %c0_i32, %c0_i32_0 : i32, i32, i32, i32
  }
}

</mosaic_0001>

<bundles_post_ra>
// kernel: tpu_custom_call.1
= control target key start
LH: loop header
LB: loop body
LE: loop exit
PB: predicated region body
PF: predicated region fallthrough
CT: control target
= control target key end

     0   :  { %9 = vsyncpa [#allocation3], 0  ;;  %s1223_s0 = inlined_call_operand.hbm [shape: f32[2,8,128], index: 0, kind: input, shape index: {}]   ;;  %s1224_s1 = inlined_call_operand.hbm [shape: f32[2,128,128], index: 1, kind: input, shape index: {}]   ;;  %s1225_s2 = inlined_call_operand.hbm [shape: f32[2,8,128], index: 2, kind: output, shape index: {0}]   ;;  %s1226_s3 = inlined_call_operand.hbm [shape: f32[2,1,8,128], index: 3, kind: output, shape index: {1}]  }
   0x1   :  { %11 = vsyncpa [#allocation3 + $0x1], 0 }
   0x2   :  { %12 = vsyncpa [#allocation6], 0 }
   0x3   :  { %13 = vsyncpa [#allocation4], 0 }
   0x4   :  { %15 = vsyncpa [#allocation4 + $0x1], 0 }
   0x5   :  { %16 = vsyncpa [#allocation9], 0 }
   0x6   :  { %18 = vsyncpa [#allocation9 + $0x1], 0  ;;  %s971_s12 = smov 0   ;;  %s973_s13 = smov 0  }
   0x7   :  { %s975_s14 = smov 0   ;;  %s977_s15 = smov 0  }
   0x8   :  { %s979_s16 = smov 0   ;;  %s981_s17 = smov 0  }
   0x9 LB: > { %s569_s18 = sadd.s32 4294967295, %s941_s17   ;;  %s570_s19 = sadd.s32 4294967294, %s941_s17   ;;  %s941_s17 = sphi %s981_s17, %s24_s17   ;;  %s937_s16 = sphi %s979_s16, %s1244_s16   ;;  %s933_s15 = sphi %s977_s15, %s1243_s15   ;;  %s929_s14 = sphi %s975_s14, %s1242_s14   ;;  %s925_s13 = sphi %s973_s13, %s1241_s13   ;;  %s921_s12 = sphi %s971_s12, %s1240_s12  }
   0xa   : > { %p58_p0 = scmp.ne.s32.totalorder %s925_s13, %s921_s12  ;;  %p1005_p1 = scmp.eq.s32.totalorder %s569_s18, 0 }
   0xb   : > { %p1009_p2 = scmp.eq.s32.totalorder %s569_s18, 1  ;;  %p111_p3 = scmp.eq.s32.totalorder %s570_s19, 1 }
   0xc   : > { %p1015_p4 = por %p1005_p1, %p58_p0  ;;  %p571_p5 = scmp.ge.s32.totalorder %s941_s17, 1 }
   0xd   : > { %p1020_p6 = por %p111_p3, %p58_p0  ;;  %p146_p7 = scmp.lt.s32.totalorder %s941_s17, 3 }
   0xe   : > { %s1230_s22 = scalar_select %p1015_p4, 1, 0 }
   0xf   : > { %s1231_s23 = scalar_select %p1020_p6, 1, 0 }
  0x10   : > { %p1025_p8 = pnand %p571_p5, %p146_p7  ;;  %s943_s25 = smov [#allocation5]  }
  0x11   : > { %s158_s26 = sshll.u32 %s943_s25, 4  ;;  %s36_s28 = sadd.s32 1, %s937_s16  ;;  %s159_s26 = int_to_ptr.vmem [resolvable:$true] %s158_s26 }
  0x12   : > { %p701_p9 = pneg %p1025_p8  ;;  %s784_s29 = scalar_lea.vmem %s159_s26, 4096 }
  0x13   : > { %p785_p13 = scmp.ne.s32.totalorder %s159_s26, %s784_s29  ;;  %p792_p5 = scmp.lt.s32.totalorder %s159_s26, %s159_s26 }
  0x14   : > { %p1034_p11 = pnand %p701_p9, %p1005_p1  ;;  %p793_p7 = scmp.lt.s32.totalorder %s784_s29, %s784_s29 }
  0x16   : > { %p775_p12 = pneg %p1034_p11  ;;  %p794_p6 = por %p793_p7, %p792_p5 }
  0x18   : > { %p787_p0 = pnand %p785_p13, %p775_p12 }
  0x1a   : > { %p788_p3 = pneg %p787_p0 }
  0x1c   : > { %p795_p4 = pnand %p794_p6, %p788_p3 }
  0x1e   : > { %798 = shalt.err (!%p795_p4)
}
  0x1f   : > { %s944_s30 = smov 128   ;;  %s945_s4 = smov 8  }
  0x20   : > { %704 = dma.hbm_to_vmem [thread:$0]  (!%p1034_p11), %s1224_s1, 4096, %s159_s26, [#allocation6], %s944_s30, %s944_s30, %s945_s4  }
  0x21   : > { %p38_p6 = scmp.ge.s32.totalorder %s36_s28, 2  ;;  %s45_s7 = sadd.s32 1, %s929_s14 }
  0x22   : > { %p52_p4 = scmp.ne.s32.totalorder %s929_s14, %s925_s13  ;;  %p53_p9 = scmp.eq.s32.totalorder %s941_s17, 0 }
  0x23   : > { %s1246_s28 = smov (%p38_p6, %s36_s28), 0  ;;  %p717_p0 = scmp.lt.s32.totalorder %s941_s17, 2 }
  0x24   : > { %p1052_p12 = por %p53_p9, %p52_p4  ;;  %p1058_p13 = por %p1009_p2, %p52_p4 }
  0x25   : > { %s40_s10 = ssub.s32 %s937_s16, %s1246_s28  ;;  %s172_s11 = sand.u32 1, %s929_s14  }
  0x26   : > { %p43_p11 = scmp.eq.s32.totalorder %s40_s10, 0  ;;  %s574_s18 = sshll.u32 %s172_s11, 3 }
  0x27   : > { %s575_s25 = sshll.u32 %s937_s16, 7  ;;  %s176_s30 = scalar_lea.vmem [#allocation2], %s574_s18 }
  0x28   : > { %s1067_s19 = scalar_select %p43_p11, %s929_s14, %s45_s7  }
  0x29   : > { %s182_s29 = scalar_lea.hbm %s1223_s0, %s575_s25  ;;  %s184_s4 = sshll.u32 %s176_s30, 4  ;;  %s185_s4 = int_to_ptr.vmem [resolvable:$true] %s184_s4 }
  0x2a   : > { %p1075_p2 = pnand %p717_p0, %p1052_p12  ;;  %s173_s5 = scalar_lea.sflag [#allocation3], %s172_s11 }
  0x2b   : > { %s812_s6 = scalar_lea.vmem %s185_s4, 128  ;;  %s946_s7 = smov [#allocation2]  }
  0x2c   : > { %p801_p3 = pneg %p1075_p2  ;;  %p813_p5 = scmp.ne.s32.totalorder %s185_s4, %s812_s6 }
  0x2d   : > { %s817_s10 = sshll.u32 %s946_s7, 4  ;;  %s818_s10 = int_to_ptr.vmem [resolvable:$false] %s817_s10 }
  0x2e   : > { %p815_p7 = pnand %p813_p5, %p801_p3  ;;  %s819_s25 = scalar_lea.vmem %s818_s10, 256 }
  0x2f   : > { %p820_p4 = scmp.lt.s32.totalorder %s185_s4, %s818_s10  ;;  %p821_p9 = scmp.lt.s32.totalorder %s819_s25, %s812_s6 }
  0x30   : > { %p816_p6 = pneg %p815_p7 }
  0x31   : > { %p822_p11 = por %p821_p9, %p820_p4 }
  0x33   : > { %p823_p10 = pnand %p822_p11, %p816_p6 }
  0x35   : > { %826 = shalt.err (!%p823_p10)
}
  0x36   : > { %708 = dma.hbm_to_vmem [thread:$0]  (!%p1075_p2), %s182_s29, 128, %s185_s4, %s173_s5  }
  0x37   : > { %193 = sbr.rel (%p1025_p8) target bundleno = 328 (0x148), region = 28  ;;  %s1086_s8 = sand.u32 (!%p1025_p8), 1, %s925_s13  }
  0x38   : > { %s1089_s11 = sshll.u32 (!%p1025_p8), %s1086_s8, 3  ;;  %s196_s18 = scalar_lea.sflag (!%p1025_p8), [#allocation3], %s1086_s8 }
  0x39   : > { %s199_s26 = scalar_lea.vmem (!%p1025_p8), [#allocation2], %s1089_s11  ;;  %p1237_p12 = scmp.ne.s32.totalorder (!%p1025_p8), %s1230_s22, 0 }
  0x3c   : > { %904 = dma.done.wait (%p1237_p12), %s196_s18, 128  }
  0x3d   : > { %906 = vsyncadd (%p1237_p12), %s196_s18, 4294967168 }
  0x3e   : > { %908 = dma.done.wait (%p1005_p1), [#allocation6], 4096  }
  0x3f   : > { %910 = vsyncadd (%p1005_p1), [#allocation6], 4294963200  ;;  %v947_v0 = vmov 0.0   ;;  %vm948_vm0 = vmmov 0   ;;  %v264_v1 = vld [vmem:[#allocation5 + $0xf8] sm:$0xff]  ;;  %v263_v3 = vld [vmem:[#allocation5 + $0xf0] sm:$0xff]  ;;  %v336_v34 = vlaneseq }
  0x40   : > { %621 = vmatprep.subr.mxu0 %v947_v0  ;;  %656 = vmatprep.subr.mxu1 %v947_v0  ;;  %v247_v2 = vld [vmem:[#allocation5 + $0x78] sm:$0xff]  ;;  %v246_v4 = vld [vmem:[#allocation5 + $0x70] sm:$0xff]  ;;  %v262_v5 = vld [vmem:[#allocation5 + $0xe8] sm:$0xff]  ;;  %s583_s20 = sshll.u32 %s933_s15, 7  ;;  %s230_s22 = scalar_lea.vmem [#allocation8], %s1089_s11 }
  0x41   : > { %653 = vmatprep.mubr.msk.f32.mxu0 %vm948_vm0, %v947_v0  ;;  %688 = vmatprep.mubr.msk.f32.mxu1 %vm948_vm0, %v947_v0  ;;  %v245_v6 = vld [vmem:[#allocation5 + $0x68] sm:$0xff]  ;;  %v261_v7 = vld [vmem:[#allocation5 + $0xe0] sm:$0xff]  ;;  %v260_v9 = vld [vmem:[#allocation5 + $0xd8] sm:$0xff]  ;;  %v337_v35 = vshrl.u32 %v336_v34, 7  ;;  %s446_s24 = sshll.u32 %s230_s22, 4  ;;  %s223_s27 = scalar_lea.vmem [#allocation7], %s1089_s11  ;;  %s1147_s24 = int_to_ptr.vmem [resolvable:$true] %s446_s24 }
  0x42   : > { %622 = vmatpush3.msra.mxu0 %v264_v1  ;;  %657 = vmatpush3.msra.mxu1 %v247_v2  ;;  %v244_v8 = vld [vmem:[#allocation5 + $0x60] sm:$0xff]  ;;  %v243_v10 = vld [vmem:[#allocation5 + $0x58] sm:$0xff]  ;;  %v259_v11 = vld [vmem:[#allocation5 + $0xd0] sm:$0xff]  ;;  %s432_s29 = sshll.u32 %s223_s27, 4  ;;  %s1145_s21 = scalar_lea.hbm %s1226_s3, %s583_s20  ;;  %s1154_s29 = int_to_ptr.vmem [resolvable:$true] %s432_s29 }
  0x43   : > { %623 = vmatprep.subr.mxu0 %v947_v0  ;;  %658 = vmatprep.subr.mxu1 %v947_v0  ;;  %v242_v12 = vld [vmem:[#allocation5 + $0x50] sm:$0xff]  ;;  %v258_v13 = vld [vmem:[#allocation5 + $0xc8] sm:$0xff]  ;;  %v257_v15 = vld [vmem:[#allocation5 + $0xc0] sm:$0xff]  ;;  %vm338_vm1 = vcmp.eq.s32.totalorder %v337_v35, 0  ;;  %s1152_s6 = scalar_lea.hbm %s1225_s2, %s583_s20  ;;  %s418_s7 = scalar_lea.sflag [#allocation9], %s1086_s8 }
  0x44   : > { %624 = vmatpush3.msra.mxu0 %v263_v3  ;;  %659 = vmatpush3.msra.mxu1 %v246_v4  ;;  %v241_v14 = vld [vmem:[#allocation5 + $0x48] sm:$0xff]  ;;  %v240_v16 = vld [vmem:[#allocation5 + $0x40] sm:$0xff]  ;;  %v256_v17 = vld [vmem:[#allocation5 + $0xb8] sm:$0xff]  ;;  %s827_s10 = scalar_lea.vmem %s1147_s24, 128  ;;  %s949_s25 = smov [#allocation8]  }
  0x45   : > { %625 = vmatprep.subr.mxu0 %v947_v0  ;;  %660 = vmatprep.subr.mxu1 %v947_v0  ;;  %v239_v18 = vld [vmem:[#allocation5 + $0x38] sm:$0xff]  ;;  %v255_v19 = vld [vmem:[#allocation5 + $0xb0] sm:$0xff]  ;;  %v254_v21 = vld [vmem:[#allocation5 + $0xa8] sm:$0xff]  ;;  %p828_p1 = scmp.ne.s32.totalorder %s1147_s24, %s827_s10  ;;  %s831_s18 = sshll.u32 %s949_s25, 4  ;;  %s832_s18 = int_to_ptr.vmem [resolvable:$false] %s831_s18 }
  0x46   : > { %626 = vmatpush3.msra.mxu0 %v262_v5  ;;  %661 = vmatpush3.msra.mxu1 %v245_v6  ;;  %v238_v20 = vld [vmem:[#allocation5 + $0x30] sm:$0xff]  ;;  %v237_v22 = vld [vmem:[#allocation5 + $0x28] sm:$0xff]  ;;  %v253_v23 = vld [vmem:[#allocation5 + $0xa0] sm:$0xff]  ;;  %p834_p0 = scmp.lt.s32.totalorder %s1147_s24, %s832_s18 }
  0x47   : > { %627 = vmatprep.subr.mxu0 %v947_v0  ;;  %662 = vmatprep.subr.mxu1 %v947_v0  ;;  %v236_v24 = vld [vmem:[#allocation5 + $0x20] sm:$0xff]  ;;  %v252_v25 = vld [vmem:[#allocation5 + $0x98] sm:$0xff]  ;;  %v251_v27 = vld [vmem:[#allocation5 + $0x90] sm:$0xff]  ;;  %p829_p8 = pnand %p828_p1, %p1058_p13 }
  0x48   : > { %628 = vmatpush3.msra.mxu0 %v261_v7  ;;  %663 = vmatpush3.msra.mxu1 %v244_v8  ;;  %v235_v26 = vld [vmem:[#allocation5 + $0x18] sm:$0xff]  ;;  %v234_v28 = vld [vmem:[#allocation5 + $0x10] sm:$0xff]  ;;  %v250_v29 = vld [vmem:[#allocation5 + $0x88] sm:$0xff] }
  0x49   : > { %629 = vmatprep.subr.mxu0 %v947_v0  ;;  %664 = vmatprep.subr.mxu1 %v947_v0  ;;  %v233_v30 = vld [vmem:[#allocation5 + $0x8] sm:$0xff]  ;;  %v249_v31 = vld [vmem:[#allocation5 + $0x80] sm:$0xff]  ;;  %v231_v33 = vld [vmem:[%s199_s26] sm:$0xff]  ;;  %p830_p10 = pneg %p829_p8  ;;  %s833_s26 = scalar_lea.vmem %s832_s18, 256 }
  0x4a   : > { %630 = vmatpush3.msra.mxu0 %v260_v9  ;;  %665 = vmatpush3.msra.mxu1 %v243_v10  ;;  %v232_v32 = vld [vmem:[#allocation5] sm:$0xff]  ;;  %p835_p2 = scmp.lt.s32.totalorder %s833_s26, %s827_s10 }
  0x4b   : > { %631 = vmatprep.subr.mxu0 %v947_v0  ;;  %666 = vmatprep.subr.mxu1 %v947_v0 }
  0x4c   : > { %632 = vmatpush3.msra.mxu0 %v259_v11  ;;  %667 = vmatpush3.msra.mxu1 %v242_v12  ;;  %p836_p3 = por %p835_p2, %p834_p0 }
  0x4d   : > { %633 = vmatprep.subr.mxu0 %v947_v0  ;;  %668 = vmatprep.subr.mxu1 %v947_v0 }
  0x4e   : > { %634 = vmatpush3.msra.mxu0 %v258_v13  ;;  %669 = vmatpush3.msra.mxu1 %v241_v14  ;;  %p837_p5 = pnand %p836_p3, %p830_p10 }
  0x4f   : > { %635 = vmatprep.subr.mxu0 %v947_v0  ;;  %670 = vmatprep.subr.mxu1 %v947_v0 }
  0x50   : > { %636 = vmatpush3.msra.mxu0 %v257_v15  ;;  %671 = vmatpush3.msra.mxu1 %v240_v16 }
  0x51   : > { %637 = vmatprep.subr.mxu0 %v947_v0  ;;  %672 = vmatprep.subr.mxu1 %v947_v0 }
  0x52   : > { %638 = vmatpush3.msra.mxu0 %v256_v17  ;;  %673 = vmatpush3.msra.mxu1 %v239_v18 }
  0x53   : > { %639 = vmatprep.subr.mxu0 %v947_v0  ;;  %674 = vmatprep.subr.mxu1 %v947_v0 }
  0x54   : > { %640 = vmatpush3.msra.mxu0 %v255_v19  ;;  %675 = vmatpush3.msra.mxu1 %v238_v20 }
  0x55   : > { %641 = vmatprep.subr.mxu0 %v947_v0  ;;  %676 = vmatprep.subr.mxu1 %v947_v0 }
  0x56   : > { %642 = vmatpush3.msra.mxu0 %v254_v21  ;;  %677 = vmatpush3.msra.mxu1 %v237_v22 }
  0x57   : > { %643 = vmatprep.subr.mxu0 %v947_v0  ;;  %678 = vmatprep.subr.mxu1 %v947_v0 }
  0x58   : > { %644 = vmatpush3.msra.mxu0 %v253_v23  ;;  %679 = vmatpush3.msra.mxu1 %v236_v24 }
  0x59   : > { %645 = vmatprep.subr.mxu0 %v947_v0  ;;  %680 = vmatprep.subr.mxu1 %v947_v0 }
  0x5a   : > { %646 = vmatpush3.msra.mxu0 %v252_v25  ;;  %681 = vmatpush3.msra.mxu1 %v235_v26 }
  0x5b   : > { %647 = vmatprep.subr.mxu0 %v947_v0  ;;  %682 = vmatprep.subr.mxu1 %v947_v0 }
  0x5c   : > { %648 = vmatpush3.msra.mxu0 %v251_v27  ;;  %683 = vmatpush3.msra.mxu1 %v234_v28 }
  0x5d   : > { %649 = vmatprep.subr.mxu0 %v947_v0  ;;  %684 = vmatprep.subr.mxu1 %v947_v0 }
  0x5e   : > { %650 = vmatpush3.msra.mxu0 %v250_v29  ;;  %685 = vmatpush3.msra.mxu1 %v233_v30 }
  0x5f   : > { %651 = vmatprep.subr.mxu0 %v947_v0  ;;  %686 = vmatprep.subr.mxu1 %v947_v0 }
  0x60   : > { %652 = vmatpush3.msra.mxu0 %v249_v31  ;;  %687 = vmatpush3.msra.mxu1 %v232_v32 }
  0x61   : > { %654 = vmatmul.mubr.f32.vlgmr.msra.gmra.mxu0 %v231_v33  ;;  %689 = vmatmul.mubr.f32.vlgmr.msra.gmra.mxu1 %v231_v33 }
 0x121   : > { %v331_v36 = vpop.f32.mrf.mxu0  ;;  %v406_v37 = vpop.f32.mrf.mxu1 }
 0x122   : > { %v335_v38 = vrot.slane %v331_v36, 7 }
 0x123   : > { %v655_v39 = vpop.f32.mrf.mxu0  ;;  %v690_v40 = vpop.f32.mrf.mxu1 }
 0x124   : > { %411 = vst [vmem:[%s230_s22] sm:$0xff] %v335_v38  ;;  %v339_v41 = vsel %vm338_vm1, 0.0, %v335_v38 }
 0x125   : > { %v407_v42 = vadd.f32 %v406_v37, %v339_v41 }
 0x126   : > { %840 = shalt.err (!%p837_p5)
}
 0x127   : > { %s841_s20 = scalar_lea.hbm %s1145_s21, 128  ;;  %s845_s4 = scalar_lea.hbm %s1226_s3, 256 }
 0x128   : > { %p842_p7 = scmp.ne.s32.totalorder %s1145_s21, %s841_s20  ;;  %p846_p9 = scmp.lt.s32.totalorder %s1145_s21, %s1226_s3 }
 0x129   : > { %p847_p11 = scmp.lt.s32.totalorder %s845_s4, %s841_s20 }
 0x12a   : > { %p843_p6 = pnand %p842_p7, %p1058_p13 }
 0x12b   : > { %p848_p12 = por %p847_p11, %p846_p9 }
 0x12c   : > { %p844_p4 = pneg %p843_p6 }
 0x12e   : > { %p849_p1 = pnand %p848_p12, %p844_p4 }
 0x130   : > { %852 = shalt.err (!%p849_p1)
}
 0x131   : > { %698 = dma.vmem_to_hbm [thread:$0]  (%p1058_p13), %s1147_s24, 128, %s1145_s21, %s418_s7   ;;  %410 = vst [vmem:[%s223_s27] sm:$0xff] %v407_v42 }
 0x132   : > { %s413_s10 = scalar_lea.sflag [#allocation4], %s1086_s8  ;;  %s853_s25 = scalar_lea.vmem %s1154_s29, 128 }
 0x133   : > { %p854_p8 = scmp.ne.s32.totalorder %s1154_s29, %s853_s25  ;;  %s950_s18 = smov [#allocation7]  }
 0x134   : > { %s857_s26 = sshll.u32 %s950_s18, 4  ;;  %s858_s26 = int_to_ptr.vmem [resolvable:$false] %s857_s26 }
 0x135   : > { %p855_p10 = pnand %p854_p8, %p1058_p13  ;;  %s859_s20 = scalar_lea.vmem %s858_s26, 256 }
 0x136   : > { %p860_p2 = scmp.lt.s32.totalorder %s1154_s29, %s858_s26  ;;  %p861_p3 = scmp.lt.s32.totalorder %s859_s20, %s853_s25 }
 0x137   : > { %p856_p0 = pneg %p855_p10 }
 0x138   : > { %p862_p5 = por %p861_p3, %p860_p2 }
 0x13a   : > { %p863_p7 = pnand %p862_p5, %p856_p0 }
 0x13c   : > { %866 = shalt.err (!%p863_p7)
}
 0x13d   : > { %s867_s11 = scalar_lea.hbm %s1152_s6, 128  ;;  %s871_s27 = scalar_lea.hbm %s1225_s2, 256 }
 0x13e   : > { %p868_p6 = scmp.ne.s32.totalorder %s1152_s6, %s867_s11  ;;  %p872_p11 = scmp.lt.s32.totalorder %s1152_s6, %s1225_s2 }
 0x13f   : > { %p873_p12 = scmp.lt.s32.totalorder %s871_s27, %s867_s11 }
 0x140   : > { %p869_p4 = pnand %p868_p6, %p1058_p13 }
 0x141   : > { %p874_p1 = por %p873_p12, %p872_p11 }
 0x142   : > { %p870_p9 = pneg %p869_p4 }
 0x144   : > { %p875_p8 = pnand %p874_p1, %p870_p9 }
 0x146   : > { %878 = shalt.err (!%p875_p8)
}
 0x147   : > { %697 = dma.vmem_to_hbm [thread:$0]  (%p1058_p13), %s1154_s29, 128, %s1152_s6, %s413_s10  }
 0x148 PF: > { %s458_s22 = sand.u32 1, %s921_s12   ;;  %p1238_p10 = scmp.ne.s32.totalorder %s1231_s23, 0 }
 0x149   : > { %p1239_p0 = scmp.ge.s32.totalorder %s941_s17, 2  ;;  %s459_s30 = scalar_lea.sflag [#allocation4], %s458_s22 }
 0x14b   : > { %p710_p2 = pnand %p1239_p0, %p1238_p10 }
 0x14d   : > { %p711_p3 = pneg %p710_p2 }
 0x14f   : > { %912 = dma.done.wait (%p711_p3), %s459_s30, 128  }
 0x150   : > { %914 = vsyncadd (%p711_p3), %s459_s30, 4294967168  ;;  %s468_s4 = scalar_lea.sflag [#allocation9], %s458_s22 }
 0x151   : > { %916 = dma.done.wait (%p711_p3), %s468_s4, 128  }
 0x152   : > { %918 = vsyncadd (%p711_p3), %s468_s4, 4294967168  ;;  %s24_s17 = sadd.s32 1, %s941_s17   ;;  %s1240_s12 = smov %s925_s13 }
 0x153   : > { %p21_p5 = scmp.ge.s32.totalorder %s24_s17, 4   ;;  %s1241_s13 = smov %s929_s14 }
 0x154   : > { %s1242_s14 = smov %s1067_s19  ;;  %s1243_s15 = smov %s937_s16 }
 0x155   : > { %s1244_s16 = smov %s1246_s28  ;;  %23 = sbr.rel (!%p21_p5) target bundleno = 9 (0x9), region = 95 }
 0x15a   :  { %473 = vsyncpa [#allocation3], 1 }
 0x15b   :  { %475 = vsyncpa [#allocation3 + $0x1], 1 }
 0x15c   :  { %476 = vsyncpa [#allocation6], 1 }
 0x15d   :  { %477 = vsyncpa [#allocation4], 1 }
 0x15e   :  { %479 = vsyncpa [#allocation4 + $0x1], 1 }
 0x15f   :  { %480 = vsyncpa [#allocation9], 1 }
 0x160   :  { %482 = vsyncpa [#allocation9 + $0x1], 1 }

</bundles_post_ra>
